<compile_context>
chip_gen: v5e
topology: v5e:2x2
jax: 0.10.0
libtpu: 0.0.40
codegen_flags: <defaults>
</compile_context>

<pallas_src>
import jax
import jax.numpy as jnp
from jax import lax
from jax.experimental import pallas as pl
from jax.experimental.pallas import tpu as pltpu

BN_EPS = 1e-5


# -------------------- stage 1: linear1 + BatchNorm1d + ReLU -------------------

def _stage1_kernel(x_ref, w1_ref, gamma_ref, beta_ref, h_ref, acc_ref):
    """Grid = (hidden_tiles, k_tiles); axis 1 (in_dim / K) is the reduction."""
    k = pl.program_id(1)

    @pl.when(k == 0)
    def _init():
        acc_ref[...] = jnp.zeros_like(acc_ref)

    # MXU: bf16 inputs, f32 accumulation (astype is a no-op if x is already bf16).
    acc_ref[...] += jnp.dot(x_ref[...].astype(jnp.bfloat16), w1_ref[...],
                            preferred_element_type=jnp.float32)

    @pl.when(k == pl.num_programs(1) - 1)
    def _finalize():
        h = acc_ref[...]                                   # (B, ht) f32
        inv_b = 1.0 / h.shape[0]
        # One-pass batch statistics (biased variance), PyTorch training mode.
        # Kept in f32 (mild E[h^2]-mean^2 cancellation risk is fine at BN scales).
        # Note: linear1's bias is cancelled exactly by the mean subtraction of
        # training-mode BN, so it is dropped from the kernel entirely.
        mean = jnp.sum(h, axis=0, keepdims=True) * inv_b
        var = jnp.sum(h * h, axis=0, keepdims=True) * inv_b - mean * mean
        scale = gamma_ref[...] * lax.rsqrt(var + BN_EPS)   # EUP rsqrt (free slot)
        shift = beta_ref[...] - mean * scale
        h_ref[...] = jnp.maximum(h * scale + shift, 0.0).astype(h_ref.dtype)


# ------------------------------ stage 2: layer2 --------------------------------

def _stage2_kernel(h_ref, w2_ref, b2_ref, o_ref):
    out = jnp.dot(h_ref[...], w2_ref[...], preferred_element_type=jnp.float32)
    o_ref[...] = (out + b2_ref[...]).astype(o_ref.dtype)


# --------------------------------- wrapper -------------------------------------

def _pick_tile(dim, prefs):
    for t in prefs:
        if t <= dim and dim % t == 0:
            return t
    return dim


def _vmem_limit_bytes(need_bytes):
    """Generation-aware scoped-VMEM limit (cap below physical VMEM)."""
    cap = 64 * 1024 * 1024  # conservative default = v7x per-TC VMEM
    try:
        cap = int(getattr(pltpu.get_tpu_info(), "vmem_capacity_bytes", cap)) or cap
    except Exception:
        pass
    return min(int(0.8 * cap), max(32 * 1024 * 1024, int(1.25 * need_bytes)))


def prediction_mlp_forward(x, params, *, out_dtype=jnp.float32,
                           k_tile=None, hidden_tile=None,
                           batch_tile=None, out_tile=None):
    """x: (B, in_dim), f32 or bf16 (bf16 preferred: halves x HBM traffic).
    params: dict from init_params (matmul weights stored bf16)."""
    B, in_dim = x.shape
    hidden = params["w1_t"].shape[1]
    out_dim = params["w2_t"].shape[1]

    # Lane-dense, MXU-friendly tiles (256-multiples for v6e/v7x, 128 for v5e).
    k_tile = k_tile or _pick_tile(in_dim, (512, 256, 128))
    hidden_tile = hidden_tile or _pick_tile(hidden, (256, 128))
    out_tile = out_tile or _pick_tile(out_dim, (512, 256, 128))
    batch_tile = batch_tile or _pick_tile(B, (256, 128, 64, 32, 16, 8))
    assert in_dim % k_tile == 0 and hidden % hidden_tile == 0
    assert out_dim % out_tile == 0 and B % batch_tile == 0

    xb = jnp.dtype(x.dtype).itemsize
    ob = jnp.dtype(out_dtype).itemsize

    # TODO(synk): once 2*B*k_tile*xb + ~4*B*hidden_tile*4 exceeds the VMEM cap
    # (B around 2k at in_dim=2048 on v7x), tile the batch in stage 1 and switch
    # BN to a two-pass cross-tile sum/sumsq accumulator.

    # ---------------- call 1: linear1 + BN + ReLU -> bf16 h ----------------
    need1 = (2 * (B * k_tile * xb + k_tile * hidden_tile * 2
                  + 2 * hidden_tile * 4)               # streamed inputs (x2 bufs)
             + 2 * B * hidden_tile * 2                 # bf16 h output buffers
             + B * hidden_tile * 4                     # f32 accumulator scratch
             + 3 * B * hidden_tile * 4)                # stage-1 f32 temporaries
    cost1 = pl.CostEstimate(
        flops=2 * B * in_dim * hidden,
        transcendentals=hidden,                        # one rsqrt per column
        bytes_accessed=(B * in_dim * xb + in_dim * hidden * 2
                        + 2 * hidden * 4 + B * hidden * 2))

    h = pl.pallas_call(
        _stage1_kernel,
        out_shape=jax.ShapeDtypeStruct((B, hidden), jnp.bfloat16),
        grid_spec=pltpu.PrefetchScalarGridSpec(
            num_scalar_prefetch=0,
            grid=(hidden // hidden_tile, in_dim // k_tile),
            in_specs=[
                pl.BlockSpec((B, k_tile), lambda i, k: (0, k)),            # x
                pl.BlockSpec((k_tile, hidden_tile), lambda i, k: (k, i)),  # W1
                pl.BlockSpec((1, hidden_tile), lambda i, k: (0, i)),       # gamma
                pl.BlockSpec((1, hidden_tile), lambda i, k: (0, i)),       # beta
            ],
            out_specs=pl.BlockSpec((B, hidden_tile), lambda i, k: (0, i)),
            scratch_shapes=[pltpu.VMEM((B, hidden_tile), jnp.float32)],
        ),
        compiler_params=pltpu.CompilerParams(
            # hidden tiles are independent (per-column BN stats) -> parallel;
            # the K axis carries the accumulator -> arbitrary.
            dimension_semantics=("parallel", "arbitrary"),
            vmem_limit_bytes=_vmem_limit_bytes(need1)),
        cost_estimate=cost1,
    )(x, params["w1_t"], params["gamma"], params["beta"])

    # ----------------------- call 2: layer2 matmul -------------------------
    need2 = (2 * (batch_tile * hidden * 2 + hidden * out_tile * 2
                  + out_tile * 4 + batch_tile * out_tile * ob)
             + batch_tile * out_tile * 4)              # f32 result before cast
    cost2 = pl.CostEstimate(
        flops=2 * B * hidden * out_dim,
        transcendentals=0,
        bytes_accessed=(B * hidden * 2 + hidden * out_dim * 2
                        + out_dim * 4 + B * out_dim * ob))

    out = pl.pallas_call(
        _stage2_kernel,
        out_shape=jax.ShapeDtypeStruct((B, out_dim), out_dtype),
        grid_spec=pltpu.PrefetchScalarGridSpec(
            num_scalar_prefetch=0,
            grid=(B // batch_tile, out_dim // out_tile),
            in_specs=[
                pl.BlockSpec((batch_tile, hidden), lambda i, j: (i, 0)),   # h
                pl.BlockSpec((hidden, out_tile), lambda i, j: (0, j)),     # W2
                pl.BlockSpec((1, out_tile), lambda i, j: (0, j)),          # b2
            ],
            out_specs=pl.BlockSpec((batch_tile, out_tile), lambda i, j: (i, j)),
        ),
        compiler_params=pltpu.CompilerParams(
            dimension_semantics=("parallel", "parallel"),
            vmem_limit_bytes=_vmem_limit_bytes(need2)),
        cost_estimate=cost2,
    )(h, params["w2_t"], params["b2"])
    return out


# --------------------------------- params --------------------------------------

def init_params(key, in_dim, hidden_dim, out_dim):
    """Deterministic synthetic parameters (PyTorch-Linear-like fan-in scaling).
    Matmul weights stored bf16 (MXU-native, halves weight HBM bytes).
    b1 is kept only for the PyTorch-fidelity f32 reference; the kernel drops it
    because training-mode BN cancels it exactly."""
    k1, k2, k3, k4 = jax.random.split(key, 4)
    bound1 = 1.0 / jnp.sqrt(in_dim)
    bound2 = 1.0 / jnp.sqrt(hidden_dim)
    w1_t = jax.random.uniform(k1, (in_dim, hidden_dim), jnp.float32,
                              minval=-bound1, maxval=bound1).astype(jnp.bfloat16)
    b1 = jax.random.uniform(k2, (1, hidden_dim), jnp.float32,
                            minval=-bound1, maxval=bound1)
    w2_t = jax.random.uniform(k3, (hidden_dim, out_dim), jnp.float32,
                              minval=-bound2, maxval=bound2).astype(jnp.bfloat16)
    b2 = jax.random.uniform(k4, (1, out_dim), jnp.float32,
                            minval=-bound2, maxval=bound2)
    gamma = jnp.ones((1, hidden_dim), jnp.float32)   # BatchNorm affine init
    beta = jnp.zeros((1, hidden_dim), jnp.float32)
    return {"w1_t": w1_t, "b1": b1, "gamma": gamma, "beta": beta,
            "w2_t": w2_t, "b2": b2}


# ------------------------------- references ------------------------------------

def reference_forward_mixed(x, params):
    """Pure-JAX reference mirroring the kernel's precision recipe
    (bf16 MXU inputs, f32 stats, one-pass variance, b1 dropped)."""
    h = jnp.dot(x.astype(jnp.bfloat16), params["w1_t"],
                preferred_element_type=jnp.float32)
    mean = jnp.mean(h, axis=0, keepdims=True)
    var = jnp.mean(h * h, axis=0, keepdims=True) - mean * mean
    scale = params["gamma"] * lax.rsqrt(var + BN_EPS)
    shift = params["beta"] - mean * scale
    h = jnp.maximum(h * scale + shift, 0.0).astype(jnp.bfloat16)
    return jnp.dot(h, params["w2_t"],
                   preferred_element_type=jnp.float32) + params["b2"]


def reference_forward_f32(x, params):
    """PyTorch training-mode forward, all-f32 math, including linear1's bias
    (which training-mode BN cancels, so the kernel legitimately drops it)."""
    h = x.astype(jnp.float32) @ params["w1_t"].astype(jnp.float32) + params["b1"]
    mean = jnp.mean(h, axis=0, keepdims=True)
    var = jnp.mean((h - mean) ** 2, axis=0, keepdims=True)
    h = (h - mean) / jnp.sqrt(var + BN_EPS) * params["gamma"] + params["beta"]
    h = jnp.maximum(h, 0.0)
    return h @ params["w2_t"].astype(jnp.float32) + params["b2"]


# ----------------------------------- main ---------------------------------------

if __name__ == "__main__":
    # Small shapes consistent with the module (real module: 2048 -> 512 -> 1024).
    # Tile overrides below make every grid axis run >= 2 steps:
    #   stage 1: grid (hidden 128/128 = 1, K 256/128 = 2)
    #   stage 2: grid (batch 16/8 = 2, out 256/128 = 2)
    B, IN_DIM, HIDDEN_DIM, OUT_DIM = 16, 256, 128, 256

    key = jax.random.PRNGKey(0)
    kx, kp = jax.random.split(key)
    x = jax.random.normal(kx, (B, IN_DIM), jnp.float32)
    params = init_params(kp, IN_DIM, HIDDEN_DIM, OUT_DIM)

    # bf16 x at the kernel interface (halves x HBM read / VMEM residency).
    x_bf16 = x.astype(jnp.bfloat16)

    out = prediction_mlp_forward(x_bf16, params,
                                 k_tile=128, hidden_tile=128,
                                 batch_tile=8, out_tile=128)
    out = jax.block_until_ready(out)
    assert out.shape == (B, OUT_DIM) and out.dtype == jnp.float32

    # Primary check: reference with the same precision recipe as the kernel.
    ref_mixed = reference_forward_mixed(x_bf16, params)
    assert jnp.allclose(out, ref_mixed, atol=3e-3, rtol=3e-3), \
        "mismatch vs mixed-precision reference"

    # Sanity check: within bf16 noise floor of the full-f32 PyTorch forward
    # (including the b1 bias that BN cancels).
    ref_f32 = reference_forward_f32(x, params)
    assert jnp.allclose(out, ref_f32, atol=5e-2, rtol=5e-2), \
        "mismatch vs f32 reference (beyond bf16 noise floor)"

    print("KERNEL_OK")
</pallas_src>

<mosaic_0001>
module attributes {stable_mosaic.version = 11 : i64} {
  func.func @_stage1_kernel(%arg0: i32, %arg1: i32, %arg2: memref<16x128xbf16, #tpu.memory_space<vmem>>, %arg3: memref<128x128xbf16, #tpu.memory_space<vmem>>, %arg4: memref<1x128xf32, #tpu.memory_space<vmem>>, %arg5: memref<1x128xf32, #tpu.memory_space<vmem>>, %arg6: memref<16x128xbf16, #tpu.memory_space<vmem>>, %arg7: memref<16x128xf32, #tpu.memory_space<vmem>>) attributes {dimension_semantics = [#tpu.dimension_semantics<parallel>, #tpu.dimension_semantics<arbitrary>], iteration_bounds = array<i64: 1, 2>, scalar_prefetch = 0 : i64, scratch_operands = 1 : i64, tpu.core_type = #tpu.core_type<tc>, window_params = [{transform_indices = @transform_0, window_bounds = array<i64: 16, 128>}, {transform_indices = @transform_1, window_bounds = array<i64: 128, 128>}, {transform_indices = @transform_2, window_bounds = array<i64: 1, 128>}, {transform_indices = @transform_3, window_bounds = array<i64: 1, 128>}, {transform_indices = @transform_4, window_bounds = array<i64: 16, 128>}]} {
    %c0_i32 = arith.constant 0 : i32
    %0 = arith.cmpi eq, %arg1, %c0_i32 : i32
    %1 = arith.extui %0 : i1 to i32
    %c0_i32_0 = arith.constant 0 : i32
    %2 = arith.cmpi ne, %1, %c0_i32_0 : i32
    scf.if %2 {
      %cst_9 = arith.constant 0.000000e+00 : f32
      %12 = vector.broadcast %cst_9 : f32 to vector<16x128xf32>
      %c0_10 = arith.constant 0 : index
      %c0_11 = arith.constant 0 : index
      %13 = vector.load %arg7[%c0_10, %c0_11] : memref<16x128xf32, #tpu.memory_space<vmem>>, vector<16x128xf32>
      tpu.vector_store %arg7[%c0_10, %c0_11], %12 {strides = array<i32>} : memref<16x128xf32, #tpu.memory_space<vmem>>, vector<16x128xf32>,
    } else {
    }
    %c0 = arith.constant 0 : index
    %c0_1 = arith.constant 0 : index
    %3 = vector.load %arg7[%c0, %c0_1] : memref<16x128xf32, #tpu.memory_space<vmem>>, vector<16x128xf32>
    %c0_2 = arith.constant 0 : index
    %c0_3 = arith.constant 0 : index
    %4 = vector.load %arg2[%c0_2, %c0_3] : memref<16x128xbf16, #tpu.memory_space<vmem>>, vector<16x128xbf16>
    %c0_4 = arith.constant 0 : index
    %c0_5 = arith.constant 0 : index
    %5 = vector.load %arg3[%c0_4, %c0_5] : memref<128x128xbf16, #tpu.memory_space<vmem>>, vector<128x128xbf16>
    %cst = arith.constant dense<0.000000e+00> : vector<16x128xf32>
    %6 = tpu.matmul %4, %5, %cst {dimension_numbers = #tpu.dot_dimension_numbers<[1], [0], [0], [1], [0, 0, 1, 1], [], []>} : vector<16x128xbf16>, vector<128x128xbf16>, vector<16x128xf32> -> vector<16x128xf32>
    %7 = arith.addf %3, %6 : vector<16x128xf32>
    %c0_6 = arith.constant 0 : index
    %c0_7 = arith.constant 0 : index
    %8 = vector.load %arg7[%c0_6, %c0_7] : memref<16x128xf32, #tpu.memory_space<vmem>>, vector<16x128xf32>
    tpu.vector_store %arg7[%c0_6, %c0_7], %7 {strides = array<i32>} : memref<16x128xf32, #tpu.memory_space<vmem>>, vector<16x128xf32>,
    %c1_i32 = arith.constant 1 : i32
    %9 = arith.cmpi eq, %arg1, %c1_i32 : i32
    %10 = arith.extui %9 : i1 to i32
    %c0_i32_8 = arith.constant 0 : i32
    %11 = arith.cmpi ne, %10, %c0_i32_8 : i32
    scf.if %11 {
      %c0_9 = arith.constant 0 : index
      %c0_10 = arith.constant 0 : index
      %12 = vector.load %arg7[%c0_9, %c0_10] : memref<16x128xf32, #tpu.memory_space<vmem>>, vector<16x128xf32>
      %cst_11 = arith.constant dense<0.000000e+00> : vector<128xf32>
      %13 = vector.multi_reduction <add>, %12, %cst_11 [0] : vector<16x128xf32> to vector<128xf32>
      %14 = vector.shape_cast %13 : vector<128xf32> to vector<1x128xf32>
      %cst_12 = arith.constant 6.250000e-02 : f32
      %15 = vector.broadcast %cst_12 : f32 to vector<1x128xf32>
      %16 = arith.mulf %14, %15 : vector<1x128xf32>
      %17 = arith.mulf %12, %12 : vector<16x128xf32>
      %cst_13 = arith.constant dense<0.000000e+00> : vector<128xf32>
      %18 = vector.multi_reduction <add>, %17, %cst_13 [0] : vector<16x128xf32> to vector<128xf32>
      %19 = vector.shape_cast %18 : vector<128xf32> to vector<1x128xf32>
      %cst_14 = arith.constant 6.250000e-02 : f32
      %20 = vector.broadcast %cst_14 : f32 to vector<1x128xf32>
      %21 = arith.mulf %19, %20 : vector<1x128xf32>
      %22 = arith.mulf %16, %16 : vector<1x128xf32>
      %23 = arith.subf %21, %22 : vector<1x128xf32>
      %c0_15 = arith.constant 0 : index
      %c0_16 = arith.constant 0 : index
      %24 = vector.load %arg4[%c0_15, %c0_16] : memref<1x128xf32, #tpu.memory_space<vmem>>, vector<1x128xf32>
      %cst_17 = arith.constant 9.99999974E-6 : f32
      %25 = vector.broadcast %cst_17 : f32 to vector<1x128xf32>
      %26 = arith.addf %23, %25 : vector<1x128xf32>
      %27 = math.rsqrt %26 : vector<1x128xf32>
      %28 = arith.mulf %24, %27 : vector<1x128xf32>
      %c0_18 = arith.constant 0 : index
      %c0_19 = arith.constant 0 : index
      %29 = vector.load %arg5[%c0_18, %c0_19] : memref<1x128xf32, #tpu.memory_space<vmem>>, vector<1x128xf32>
      %30 = arith.mulf %16, %28 : vector<1x128xf32>
      %31 = arith.subf %29, %30 : vector<1x128xf32>
      %32 = vector.broadcast %28 : vector<1x128xf32> to vector<16x128xf32>
      %33 = arith.mulf %12, %32 : vector<16x128xf32>
      %34 = vector.broadcast %31 : vector<1x128xf32> to vector<16x128xf32>
      %35 = arith.addf %33, %34 : vector<16x128xf32>
      %cst_20 = arith.constant 0.000000e+00 : f32
      %36 = vector.broadcast %cst_20 : f32 to vector<16x128xf32>
      %37 = arith.maximumf %35, %36 : vector<16x128xf32>
      %38 = arith.truncf %37 : vector<16x128xf32> to vector<16x128xbf16>
      %c0_21 = arith.constant 0 : index
      %c0_22 = arith.constant 0 : index
      %39 = vector.load %arg6[%c0_21, %c0_22] : memref<16x128xbf16, #tpu.memory_space<vmem>>, vector<16x128xbf16>
      tpu.vector_store %arg6[%c0_21, %c0_22], %38 {strides = array<i32>} : memref<16x128xbf16, #tpu.memory_space<vmem>>, vector<16x128xbf16>,
    } else {
    }
    return
  }
  func.func @transform_0(%arg0: i32, %arg1: i32) -> (i32, i32) {
    %c0_i32 = arith.constant 0 : i32
    %c0_i32_0 = arith.constant 0 : i32
    return %c0_i32, %arg1 : i32, i32
  }
  func.func @transform_1(%arg0: i32, %arg1: i32) -> (i32, i32) {
    %c0_i32 = arith.constant 0 : i32
    return %arg1, %arg0 : i32, i32
  }
  func.func @transform_2(%arg0: i32, %arg1: i32) -> (i32, i32) {
    %c0_i32 = arith.constant 0 : i32
    %c0_i32_0 = arith.constant 0 : i32
    return %c0_i32, %arg0 : i32, i32
  }
  func.func @transform_3(%arg0: i32, %arg1: i32) -> (i32, i32) {
    %c0_i32 = arith.constant 0 : i32
    %c0_i32_0 = arith.constant 0 : i32
    return %c0_i32, %arg0 : i32, i32
  }
  func.func @transform_4(%arg0: i32, %arg1: i32) -> (i32, i32) {
    %c0_i32 = arith.constant 0 : i32
    %c0_i32_0 = arith.constant 0 : i32
    return %c0_i32, %arg0 : i32, i32
  }
}

</mosaic_0001>

<bundles_post_ra>
// kernel: tpu_custom_call.1
= control target key start
LH: loop header
LB: loop body
LE: loop exit
PB: predicated region body
PF: predicated region fallthrough
CT: control target
= control target key end

     0   :  { %9 = vsyncpa [#allocation4], 0  ;;  %s1020_s0 = inlined_call_operand.hbm [shape: bf16[16,256], index: 0, kind: input, shape index: {}]   ;;  %s1021_s1 = inlined_call_operand.hbm [shape: bf16[256,128], index: 1, kind: input, shape index: {}]   ;;  %s1022_s2 = inlined_call_operand.vmem [shape: f32[1,128], index: 2, kind: input, shape index: {}]   ;;  %s1023_s3 = inlined_call_operand.vmem [shape: f32[1,128], index: 3, kind: input, shape index: {}]   ;;  %s1024_s4 = inlined_call_operand.hbm [shape: bf16[16,128], index: 4, kind: output, shape index: {}]  }
   0x1   :  { %11 = vsyncpa [#allocation4 + $0x1], 0 }
   0x2   :  { %12 = vsyncpa [#allocation7], 0 }
   0x3   :  { %14 = vsyncpa [#allocation7 + $0x1], 0 }
   0x4   :  { %15 = vsyncpa [#allocation5], 0  ;;  %s900_s15 = smov 0   ;;  %s902_s16 = smov 0  }
   0x5   :  { %s904_s17 = smov 0   ;;  %s906_s18 = smov 0  }
   0x6   :  { %s908_s19 = smov 0   ;;  %s910_s20 = smov 0  }
   0x7 LB: > { %s575_s21 = sadd.s32 4294967295, %s866_s20   ;;  %s30_s22 = sadd.s32 1, %s862_s19  ;;  %s866_s20 = sphi %s910_s20, %s21_s20   ;;  %s862_s19 = sphi %s908_s19, %s1032_s19   ;;  %s858_s18 = sphi %s906_s18, %s1031_s18   ;;  %s854_s17 = sphi %s904_s17, %s1030_s17   ;;  %s850_s16 = sphi %s902_s16, %s1029_s16   ;;  %s846_s15 = sphi %s900_s15, %s1028_s15  }
   0x8   : > { %p31_p0 = scmp.ge.s32.totalorder %s30_s22, 2  ;;  %s40_s23 = sadd.s32 1, %s854_s17 }
   0x9   : > { %p47_p1 = scmp.ne.s32.totalorder %s854_s17, %s850_s16  ;;  %p48_p2 = scmp.eq.s32.totalorder %s866_s20, 0 }
   0xa   : > { %s1034_s22 = smov (%p31_p0, %s30_s22), 0  ;;  %p53_p4 = scmp.ne.s32.totalorder %s850_s16, %s846_s15 }
   0xb   : > { %p936_p3 = por %p48_p2, %p47_p1  ;;  %s37_s25 = ssub.s32 %s862_s19, %s1034_s22 }
   0xc   : > { %p54_p5 = scmp.eq.s32.totalorder %s575_s21, 0  ;;  %p38_p6 = scmp.eq.s32.totalorder %s37_s25, 0 }
   0xd   : > { %p660_p8 = scmp.lt.s32.totalorder %s866_s20, 2  ;;  %s954_s28 = sand.u32 1, %s854_s17  }
   0xe   : > { %p945_p7 = por %p54_p5, %p53_p4  ;;  %s581_s29 = sshll.u32 %s862_s19, 2 }
   0xf   : > { %s951_s27 = scalar_select %p38_p6, %s854_s17, %s40_s23  }
  0x10   : > { %s580_s30 = sshll.u32 %s954_s28, 3  ;;  %s203_s7 = scalar_lea.hbm %s1020_s0, %s581_s29 }
  0x11   : > { %s204_s8 = sshll.u32 %s203_s7, 4  ;;  %s199_s9 = scalar_lea.vmem [#allocation3], %s580_s30  ;;  %s205_s8 = int_to_ptr.hbm [resolvable:$true] %s204_s8 }
  0x12   : > { %s206_s10 = sshll.u32 %s199_s9, 4  ;;  %p963_p9 = pnand %p660_p8, %p936_p3  ;;  %s207_s10 = int_to_ptr.vmem [resolvable:$true] %s206_s10 }
  0x13   : > { %p585_p10 = scmp.ge.s32.totalorder %s866_s20, 1  ;;  %s196_s12 = scalar_lea.sflag [#allocation4], %s954_s28 }
  0x14   : > { %s868_s13 = smov 128   ;;  %s869_s14 = smov 64  }
  0x15   : > { %s870_s15 = smov 4   ;;  %p237_p11 = scmp.lt.s32.totalorder %s866_s20, 3 }
  0x16   : > { %656 = dma.hbm_to_vmem [thread:$0]  (!%p963_p9), %s205_s8, 128, %s207_s10, %s196_s12, %s868_s13, %s869_s14, %s870_s15  }
  0x17   : > { %s582_s23 = sshll.u32 %s954_s28, 6  ;;  %s630_s25 = sshll.u32 %s862_s19, 6 }
  0x18   : > { %p238_p12 = pnand %p585_p10, %p237_p11  ;;  %s226_s30 = scalar_lea.hbm %s1021_s1, %s630_s25 }
  0x19   : > { %s220_s5 = scalar_lea.vmem [#allocation6], %s582_s23  ;;  %s227_s7 = sshll.u32 %s226_s30, 4  ;;  %s228_s7 = int_to_ptr.hbm [resolvable:$true] %s227_s7 }
  0x1a   : > { %s229_s6 = sshll.u32 %s220_s5, 4  ;;  %s217_s9 = scalar_lea.sflag [#allocation7], %s954_s28  ;;  %s230_s6 = int_to_ptr.vmem [resolvable:$true] %s229_s6 }
  0x1b   : > { %659 = dma.hbm_to_vmem [thread:$0]  (!%p963_p9), %s228_s7, 1024, %s230_s6, %s217_s9, %s869_s14, %s869_s14, %s870_s15  }
  0x1c   : > { %241 = sbr.rel (%p238_p12) target bundleno = 284 (0x11c), region = 36  ;;  %s243_s8 = sand.u32 (!%p238_p12), 1, %s850_s16  }
  0x1d   : > { %s586_s10 = sshll.u32 (!%p238_p12), %s243_s8, 3  ;;  %s244_s12 = scalar_lea.sflag (!%p238_p12), [#allocation4], %s243_s8 }
  0x1e   : > { %s247_s13 = scalar_lea.vmem (!%p238_p12), [#allocation3], %s586_s10 }
  0x21   : > { %833 = dma.done.wait (%p945_p7), %s244_s12, 128  }
  0x22   : > { %835 = vsyncadd (%p945_p7), %s244_s12, 4294967168  ;;  %s587_s23 = sshll.u32 %s243_s8, 6  ;;  %s254_s25 = scalar_lea.sflag [#allocation7], %s243_s8 }
  0x23   : > { %s257_s29 = scalar_lea.vmem [#allocation6], %s587_s23 }
  0x24   : > { %837 = dma.done.wait (%p945_p7), %s254_s25, 1024  }
  0x25   : > { %839 = vsyncadd (%p945_p7), %s254_s25, 4294966272  ;;  %p588_p13 = scmp.ne.s32.totalorder %s858_s18, 0 }
  0x27   : > { %299 = sbr.rel (%p588_p13) target bundleno = 47 (0x2f), region = 48 }
  0x2c   : > { %v871_v0 = vmov 0.0  }
  0x2d   : > { %300 = vst [vmem:[#allocation2] sm:$0xff] %v871_v0 }
  0x2e   : > { %301 = vst [vmem:[#allocation2 + $0x8] sm:$0xff] %v871_v0 }
  0x2f PF: > { %v639_v1 = vld [vmem:[%s257_s29 + $0x38] sm:$0xff]  ;;  %v638_v2 = vld [vmem:[%s257_s29 + $0x30] sm:$0xff]  ;;  %v637_v3 = vld [vmem:[%s257_s29 + $0x28] sm:$0xff]  ;;  %p625_p0 = scmp.ne.s32.totalorder %s858_s18, 1 }
  0x30   : > { %376 = vmatpush.bf16.msra.mxu0 %v639_v1  ;;  %v636_v4 = vld [vmem:[%s257_s29 + $0x20] sm:$0xff]  ;;  %v635_v5 = vld [vmem:[%s257_s29 + $0x18] sm:$0xff]  ;;  %v634_v6 = vld [vmem:[%s257_s29 + $0x10] sm:$0xff] }
  0x31   : > { %v633_v7 = vld [vmem:[%s257_s29 + $0x8] sm:$0xff]  ;;  %v632_v8 = vld [vmem:[%s257_s29] sm:$0xff]  ;;  %v631_v9 = vld [vmem:[%s247_s13] sm:$0xff] }
  0x34   : > { %377 = vmatpush.bf16.msra.mxu0 %v638_v2  ;;  %v302_v10 = vld [vmem:[#allocation2] sm:$0xff] }
  0x35   : > { %v303_v13 = vld [vmem:[#allocation2 + $0x8] sm:$0xff] }
  0x38   : > { %378 = vmatpush.bf16.msra.mxu0 %v637_v3 }
  0x3c   : > { %379 = vmatpush.bf16.msra.mxu0 %v636_v4 }
  0x40   : > { %380 = vmatpush.bf16.msra.mxu0 %v635_v5 }
  0x44   : > { %381 = vmatpush.bf16.msra.mxu0 %v634_v6 }
  0x48   : > { %382 = vmatpush.bf16.msra.mxu0 %v633_v7 }
  0x4c   : > { %383 = vmatpush.bf16.msra.mxu0 %v632_v8 }
  0x4f   : > { %384 = vmatmul.bf16.vlgmr.msra.gmra.mxu0 %v631_v9 }
  0xcc   : > { %v385_v11 = vpop.f32.mrf.mxu0 }
  0xcd   : > { %v390_v12 = vadd.f32 %v385_v11, %v302_v10 }
  0xcf   : > { %392 = vst [vmem:[#allocation2] sm:$0xff] %v390_v12 }
  0xd3   : > { %397 = sbr.rel (%p625_p0) target bundleno = 278 (0x116), region = 52 }
  0xd4   : > { %v387_v14 = vpop.f32.mrf.mxu0 }
  0xd5   : > { %v391_v15 = vadd.f32 %v387_v14, %v303_v13 }
  0xd7   : > { %393 = vst [vmem:[#allocation2 + $0x8] sm:$0xff] %v391_v15 }
  0xd8   : > { %v398_v16 = vld [vmem:[#allocation2] sm:$0xff] }
  0xd9   : > { %v408_v19 = vmul.f32 %v398_v16, %v398_v16  ;;  %v420_v44 = vld [vmem:[%s1022_s2] sm:$0x1] }
  0xda   : > { %v433_v48 = vld [vmem:[%s1023_s3] sm:$0x1] }
  0xde   : > { %v399_v17 = vld [vmem:[#allocation2 + $0x8] sm:$0xff] }
  0xdf   : > { %v400_v18 = vadd.f32 %v399_v17, %v398_v16  ;;  %v409_v20 = vmul.f32 %v399_v17, %v399_v17 }
  0xe1   : > { %v401_v21 = vrot.slane %v400_v18, 4  ;;  %v410_v22 = vadd.f32 %v409_v20, %v408_v19 }
  0xe3   : > { %v402_v23 = vadd.f32 %v401_v21, %v400_v18  ;;  %v411_v24 = vrot.slane %v410_v22, 4 }
  0xe5   : > { %v403_v25 = vrot.slane %v402_v23, 2  ;;  %v412_v26 = vadd.f32 %v411_v24, %v410_v22 }
  0xe7   : > { %v404_v27 = vadd.f32 %v403_v25, %v402_v23  ;;  %v413_v28 = vrot.slane %v412_v26, 2 }
  0xe9   : > { %v405_v29 = vrot.slane %v404_v27, 1  ;;  %v414_v30 = vadd.f32 %v413_v28, %v412_v26 }
  0xeb   : > { %v406_v31 = vadd.f32 %v405_v29, %v404_v27  ;;  %v415_v32 = vrot.slane %v414_v30, 1 }
  0xed   : > { %v407_v33 = vmul.f32 0.0625, %v406_v31  ;;  %v416_v34 = vadd.f32 %v415_v32, %v414_v30 }
  0xef   : > { %v417_v35 = vmul.f32 0.0625, %v416_v34  ;;  %v418_v36 = vmul.f32 %v407_v33, %v407_v33 }
  0xf1   : > { %v419_v37 = vsub.f32 %v417_v35, %v418_v36 }
  0xf3   : > { %v421_v38 = vadd.f32 1e-05, %v419_v37 }
  0xf5   : > { %718 = vrsqrt.f32 %v421_v38  ;;  %vm428_vm0 = vweird.f32 %v421_v38 }
  0xfb   : > { %v719_v39 = vpop.eup %718 }
  0xfc   : > { %v423_v40 = vmul.f32 %v719_v39, %v421_v38  ;;  %vm429_vm1 = vweird.f32 %v719_v39 }
  0xfd   : > { %vm430_vm2 = vmor %vm428_vm0, %vm429_vm1 }
  0xfe   : > { %v424_v41 = vmul.f32 %v719_v39, %v423_v40 }
 0x100   : > { %v425_v42 = vmul.f32 0.5, %v424_v41 }
 0x102   : > { %v426_v43 = vsub.f32 1.5, %v425_v42 }
 0x104   : > { %v427_v45 = vmul.f32 %v719_v39, %v426_v43 }
 0x106   : > { %v431_v46 = vsel %vm430_vm2, %v719_v39, %v427_v45 }
 0x107   : > { %v432_v47 = vmul.f32 %v431_v46, %v420_v44 }
 0x109   : > { %v434_v49 = vmul.f32 %v432_v47, %v407_v33  ;;  %v437_v50 = vperm.slane %v432_v47, 0 }
 0x10b   : > { %v435_v51 = vsub.f32 %v433_v48, %v434_v49  ;;  %v439_v52 = vmul.f32 %v437_v50, %v398_v16  ;;  %v440_v53 = vmul.f32 %v437_v50, %v399_v17 }
 0x10d   : > { %v442_v54 = vperm.slane %v435_v51, 0 }
 0x10f   : > { %v444_v55 = vadd.f32 %v442_v54, %v439_v52  ;;  %v445_v56 = vadd.f32 %v442_v54, %v440_v53 }
 0x111   : > { %v446_v57 = vmax.f32 %v444_v55, 0.0  ;;  %v447_v58 = vmax.f32 %v445_v56, 0.0 }
 0x113   : > { %v643_v59 = vpack.c.bf16 %v447_v58, %v446_v57 }
 0x115   : > { %644 = vst [vmem:[#allocation8] sm:$0xff] %v643_v59  }
 0x116 PF: > { %p661_p1 = scmp.eq.s32.totalorder %s575_s21, 1  ;;  %s461_s24 = sshll.u32 %s1024_s4, 4  ;;  %s462_s24 = int_to_ptr.hbm [resolvable:$true] %s461_s24 }
 0x117   : > { %s872_s30 = smov [#allocation8]   ;;  %s873_s6 = smov 64  }
 0x118   : > { %s459_s5 = sshll.u32 %s872_s30, 4  ;;  %s874_s7 = smov 4   ;;  %s460_s5 = int_to_ptr.vmem [resolvable:$true] %s459_s5 }
 0x119   : > { %650 = dma.vmem_to_hbm [thread:$0]  (%p661_p1), %s460_s5, 128, %s462_s24, [#allocation5], %s873_s6, %s873_s6, %s874_s7  }
 0x11a   : > { %841 = dma.done.wait (%p661_p1), [#allocation5], 128  }
 0x11b   : > { %843 = vsyncadd (%p661_p1), [#allocation5], 4294967168 }
 0x11c PF: > { %s21_s20 = sadd.s32 1, %s866_s20   ;;  %s1028_s15 = smov %s850_s16 }
 0x11d   : > { %p18_p2 = scmp.ge.s32.totalorder %s21_s20, 4   ;;  %s1029_s16 = smov %s854_s17 }
 0x11e   : > { %s1030_s17 = smov %s951_s27  ;;  %s1031_s18 = smov %s862_s19 }
 0x11f   : > { %s1032_s19 = smov %s1034_s22  ;;  %20 = sbr.rel (!%p18_p2) target bundleno = 7 (0x7), region = 101 }
 0x124   :  { %478 = vsyncpa [#allocation4], 1 }
 0x125   :  { %480 = vsyncpa [#allocation4 + $0x1], 1 }
 0x126   :  { %481 = vsyncpa [#allocation7], 1 }
 0x127   :  { %483 = vsyncpa [#allocation7 + $0x1], 1 }
 0x128   :  { %484 = vsyncpa [#allocation5], 1 }
 0x129   :  { %486 = vsyncpa [#allocation5 + $0x1], 1 }

</bundles_post_ra>
